<compile_context>
chip_gen: v7x
topology: tpu7x:2x2x1
jax: 0.10.0
libtpu: 0.0.40
codegen_flags: <defaults>
</compile_context>

<pallas_src>
import functools

import jax
import jax.numpy as jnp
from jax import lax
from jax.experimental import pallas as pl
from jax.experimental.pallas import tpu as pltpu

CONTEXT = 6
DIM = 32
CTX_PAD = 8   # context padded to the 8-sublane tile


def multi_attention_kernel(heads, head_dim,
                           mask_ref, x_ref, wqkv_ref, g_ref, b_ref,
                           w1_ref, w2_ref, o_ref):
    Bt, CP, D = x_ref.shape
    rows = heads * head_dim

    x = x_ref[...].astype(jnp.float32)                    # (Bt, CP, D)
    x2 = x.reshape(Bt * CP, D)                            # CP == 8 -> layout-trivial merge

    # Fused QKV projection: single MXU matmul, weights already (in, out).
    qkv = jnp.dot(x2, wqkv_ref[...].astype(jnp.float32),
                  preferred_element_type=jnp.float32)     # (Bt*CP, 3*rows)
    qkv = qkv.reshape(Bt, CP, 3 * rows)

    mask = mask_ref[...]                                  # (CP, CP) causal 0 / -inf
    scale = jnp.float32(head_dim ** -0.5)

    head_outs = []
    for h in range(heads):                                # static, small
        lo = h * head_dim
        qh = qkv[:, :, lo:lo + head_dim]                                  # (Bt, CP, hd)
        kh = qkv[:, :, rows + lo:rows + lo + head_dim]
        vh = qkv[:, :, 2 * rows + lo:2 * rows + lo + head_dim]
        a = jnp.einsum('bqd,bkd->bqk', qh, kh,
                       preferred_element_type=jnp.float32) * scale       # (Bt, CP, CP)
        a = a + mask[None, :, :]
        m = jnp.max(a, axis=-1, keepdims=True)
        e = jnp.exp(a - m)
        denom = jnp.sum(e, axis=-1, keepdims=True)
        s = e * pl.reciprocal(denom, approx=True)         # EUP slot, ~free
        yh = jnp.einsum('bqk,bkd->bqd', s, vh,
                        preferred_element_type=jnp.float32)               # (Bt, CP, hd)
        head_outs.append(yh.reshape(Bt * CP, head_dim))
    ycat = jnp.concatenate(head_outs, axis=-1)            # (Bt*CP, rows)

    # proj = LayerNorm(rows) -> Linear(rows, 4*rows) -> ReLU -> Linear(4*rows, D)
    mu = jnp.mean(ycat, axis=-1, keepdims=True)
    var = jnp.mean((ycat - mu) ** 2, axis=-1, keepdims=True)
    y_ln = (ycat - mu) * lax.rsqrt(var + jnp.float32(1e-5))
    y_ln = y_ln * g_ref[...] + b_ref[...]                 # (1, rows) broadcast

    h1 = jnp.maximum(
        jnp.dot(y_ln, w1_ref[...].astype(jnp.float32),
                preferred_element_type=jnp.float32), 0.0)                 # (Bt*CP, 4*rows)
    out = jnp.dot(h1, w2_ref[...].astype(jnp.float32),
                  preferred_element_type=jnp.float32)                     # (Bt*CP, D)

    o_ref[...] = (out.reshape(Bt, CP, D) + x).astype(o_ref.dtype)         # residual


def multi_attention(x, wq, wk, wv, gamma, beta, w1, w2, heads, head_dim,
                    block_batch=256):
    batch, c, d = x.shape
    assert c == CONTEXT and d == DIM
    rows = heads * head_dim

    # Host-side weight prep: fuse Q/K/V into one matrix and pre-transpose all
    # weights to (in_features, out_features) — no transposes inside the kernel.
    wqkv_t = jnp.concatenate([wq, wk, wv], axis=0).T.astype(jnp.float32)   # (D, 3*rows)
    w1_t = w1.T.astype(jnp.float32)                                        # (rows, 4*rows)
    w2_t = w2.T.astype(jnp.float32)                                        # (4*rows, D)

    # Causal mask built once on the host on the padded context.
    r = jnp.arange(CTX_PAD)
    mask = jnp.where(r[:, None] >= r[None, :], 0.0, -jnp.inf).astype(jnp.float32)

    # Pad batch to a multiple of the batch tile, and context 6 -> 8 so the
    # kernel's (Bt, 8, .) <-> (Bt*8, .) reshapes are sublane-aligned.
    # Zero-padded rows stay finite (causal mask keeps real rows untouched) and
    # are sliced off at the end.
    bb = min(block_batch, batch)
    padded_b = pl.cdiv(batch, bb) * bb
    x_in = jnp.pad(x, ((0, padded_b - batch), (0, CTX_PAD - c), (0, 0)))
    grid = (padded_b // bb,)

    kernel = functools.partial(multi_attention_kernel, heads, head_dim)

    out = pl.pallas_call(
        kernel,
        out_shape=jax.ShapeDtypeStruct((padded_b, CTX_PAD, d), x.dtype),
        grid_spec=pltpu.PrefetchScalarGridSpec(
            num_scalar_prefetch=0,
            grid=grid,
            in_specs=[
                pl.BlockSpec((CTX_PAD, CTX_PAD), lambda b: (0, 0)),    # causal mask
                pl.BlockSpec((bb, CTX_PAD, d), lambda b: (b, 0, 0)),   # X batch tile
                pl.BlockSpec((d, 3 * rows), lambda b: (0, 0)),         # fused Wqkv^T
                pl.BlockSpec((1, rows), lambda b: (0, 0)),             # LN gamma
                pl.BlockSpec((1, rows), lambda b: (0, 0)),             # LN beta
                pl.BlockSpec((rows, 4 * rows), lambda b: (0, 0)),      # MLP W1^T
                pl.BlockSpec((4 * rows, d), lambda b: (0, 0)),         # MLP W2^T
            ],
            out_specs=pl.BlockSpec((bb, CTX_PAD, d), lambda b: (b, 0, 0)),
        ),
        compiler_params=pltpu.CompilerParams(
            dimension_semantics=("parallel",)),
    )(mask, x_in, wqkv_t, gamma, beta, w1_t, w2_t)

    return out[:batch, :c, :]


def multi_attention_ref(x, wq, wk, wv, gamma, beta, w1, w2, heads, head_dim):
    """Pure-JAX reference matching the PyTorch forward."""
    batch, c, d = x.shape
    rows = heads * head_dim

    def remap(a):  # (B, C, rows) -> (B, heads, C, head_dim)
        return a.reshape(batch, c, heads, head_dim).transpose(0, 2, 1, 3)

    q = remap(x @ wq.T)
    k = remap(x @ wk.T)
    v = remap(x @ wv.T)
    a = jnp.einsum("bhqd,bhkd->bhqk", q, k) * head_dim ** -0.5
    mask = jnp.where(jnp.arange(c)[:, None] >= jnp.arange(c)[None, :], 0.0, -jnp.inf)
    a = a + mask[None, None]
    s = jax.nn.softmax(a, axis=-1)
    ycat = jnp.einsum("bhqk,bhkd->bhqd", s, v).transpose(0, 2, 1, 3).reshape(batch, c, rows)
    mu = jnp.mean(ycat, axis=-1, keepdims=True)
    var = jnp.mean((ycat - mu) ** 2, axis=-1, keepdims=True)
    y_ln = (ycat - mu) / jnp.sqrt(var + 1e-5) * gamma[0] + beta[0]
    h1 = jnp.maximum(y_ln @ w1.T, 0.0)
    return h1 @ w2.T + x


if __name__ == "__main__":
    heads, head_dim = 2, 8
    rows = heads * head_dim

    key = jax.random.PRNGKey(0)
    kq, kk, kv, k1, k2, kx1, kx2 = jax.random.split(key, 7)

    wq = jax.random.normal(kq, (rows, DIM), dtype=jnp.float32) * 0.1
    wk = jax.random.normal(kk, (rows, DIM), dtype=jnp.float32) * 0.1
    wv = jax.random.normal(kv, (rows, DIM), dtype=jnp.float32) * 0.1
    gamma = jnp.ones((1, rows), dtype=jnp.float32)   # PyTorch LayerNorm default init
    beta = jnp.zeros((1, rows), dtype=jnp.float32)
    w1 = jax.random.normal(k1, (4 * rows, rows), dtype=jnp.float32) * 0.1
    w2 = jax.random.normal(k2, (DIM, 4 * rows), dtype=jnp.float32) * 0.1

    # Tolerance is relaxed vs. 1e-4 because the softmax denominator uses the
    # approximate EUP reciprocal (expected ~1e-3-level deviations).
    TOL = 3e-3

    # Small-shape check (batch = 2, single grid step).
    x = jax.random.normal(kx1, (2, CONTEXT, DIM), dtype=jnp.float32)
    y = jax.block_until_ready(
        multi_attention(x, wq, wk, wv, gamma, beta, w1, w2, heads, head_dim))
    y_ref = multi_attention_ref(x, wq, wk, wv, gamma, beta, w1, w2, heads, head_dim)
    assert y.shape == (2, CONTEXT, DIM)
    assert jnp.allclose(y, y_ref, atol=TOL, rtol=TOL)

    # Larger-batch check exercising batch padding + multi-step "parallel" grid.
    xb = jax.random.normal(kx2, (300, CONTEXT, DIM), dtype=jnp.float32)
    yb = jax.block_until_ready(
        multi_attention(xb, wq, wk, wv, gamma, beta, w1, w2, heads, head_dim,
                        block_batch=256))
    yb_ref = multi_attention_ref(xb, wq, wk, wv, gamma, beta, w1, w2, heads, head_dim)
    assert yb.shape == (300, CONTEXT, DIM)
    assert jnp.allclose(yb, yb_ref, atol=TOL, rtol=TOL)

    print("KERNEL_OK")
</pallas_src>

<mosaic_0001>
module attributes {stable_mosaic.version = 11 : i64} {
  func.func @multi_attention_kernel(%arg0: i32, %arg1: memref<8x8xf32, #tpu.memory_space<vmem>>, %arg2: memref<2x8x32xf32, #tpu.memory_space<vmem>>, %arg3: memref<32x48xf32, #tpu.memory_space<vmem>>, %arg4: memref<1x16xf32, #tpu.memory_space<vmem>>, %arg5: memref<1x16xf32, #tpu.memory_space<vmem>>, %arg6: memref<16x64xf32, #tpu.memory_space<vmem>>, %arg7: memref<64x32xf32, #tpu.memory_space<vmem>>, %arg8: memref<2x8x32xf32, #tpu.memory_space<vmem>>) attributes {dimension_semantics = [#tpu.dimension_semantics<parallel>], iteration_bounds = array<i64: 1>, scalar_prefetch = 0 : i64, scratch_operands = 0 : i64, tpu.core_type = #tpu.core_type<tc>, window_params = [{pipeline_mode = #tpu.pipeline_mode<synchronous>, transform_indices = @transform_0, window_bounds = array<i64: 8, 8>}, {transform_indices = @transform_1, window_bounds = array<i64: 2, 8, 32>}, {pipeline_mode = #tpu.pipeline_mode<synchronous>, transform_indices = @transform_2, window_bounds = array<i64: 32, 48>}, {pipeline_mode = #tpu.pipeline_mode<synchronous>, transform_indices = @transform_3, window_bounds = array<i64: 1, 16>}, {pipeline_mode = #tpu.pipeline_mode<synchronous>, transform_indices = @transform_4, window_bounds = array<i64: 1, 16>}, {pipeline_mode = #tpu.pipeline_mode<synchronous>, transform_indices = @transform_5, window_bounds = array<i64: 16, 64>}, {pipeline_mode = #tpu.pipeline_mode<synchronous>, transform_indices = @transform_6, window_bounds = array<i64: 64, 32>}, {transform_indices = @transform_7, window_bounds = array<i64: 2, 8, 32>}]} {
    %c0 = arith.constant 0 : index
    %c0_0 = arith.constant 0 : index
    %c0_1 = arith.constant 0 : index
    %0 = vector.load %arg2[%c0, %c0_0, %c0_1] : memref<2x8x32xf32, #tpu.memory_space<vmem>>, vector<2x8x32xf32>
    %1 = vector.shape_cast %0 : vector<2x8x32xf32> to vector<16x32xf32>
    %c0_2 = arith.constant 0 : index
    %c0_3 = arith.constant 0 : index
    %2 = vector.load %arg3[%c0_2, %c0_3] : memref<32x48xf32, #tpu.memory_space<vmem>>, vector<32x48xf32>
    %cst = arith.constant dense<0.000000e+00> : vector<16x48xf32>
    %3 = tpu.matmul %1, %2, %cst {dimension_numbers = #tpu.dot_dimension_numbers<[1], [0], [0], [1], [0, 0, 1, 1], [], []>} : vector<16x32xf32>, vector<32x48xf32>, vector<16x48xf32> -> vector<16x48xf32>
    %4 = vector.shape_cast %3 : vector<16x48xf32> to vector<2x8x48xf32>
    %c0_4 = arith.constant 0 : index
    %c0_5 = arith.constant 0 : index
    %5 = vector.load %arg1[%c0_4, %c0_5] : memref<8x8xf32, #tpu.memory_space<vmem>>, vector<8x8xf32>
    %6 = vector.extract_strided_slice %4 {offsets = [0, 0, 0], sizes = [2, 8, 8], strides = [1, 1, 1]} : vector<2x8x48xf32> to vector<2x8x8xf32>
    %7 = vector.extract_strided_slice %4 {offsets = [0, 0, 16], sizes = [2, 8, 8], strides = [1, 1, 1]} : vector<2x8x48xf32> to vector<2x8x8xf32>
    %8 = vector.extract_strided_slice %4 {offsets = [0, 0, 32], sizes = [2, 8, 8], strides = [1, 1, 1]} : vector<2x8x48xf32> to vector<2x8x8xf32>
    "tpu.trace_start"() <{level = 10 : i32, message = "bqd,bkd->bqk"}> : () -> ()
    %cst_6 = arith.constant dense<0.000000e+00> : vector<2x8x8xf32>
    %9 = tpu.matmul %6, %7, %cst_6 {dimension_numbers = #tpu.dot_dimension_numbers<[2], [2], [1], [1], [0, 0, 0, 1, 1, 1], [0], [0]>} : vector<2x8x8xf32>, vector<2x8x8xf32>, vector<2x8x8xf32> -> vector<2x8x8xf32>
    "tpu.trace_stop"() : () -> ()
    %cst_7 = arith.constant 0.353553385 : f32
    %10 = vector.broadcast %cst_7 : f32 to vector<2x8x8xf32>
    %11 = arith.mulf %9, %10 : vector<2x8x8xf32>
    %12 = vector.shape_cast %5 : vector<8x8xf32> to vector<1x8x8xf32>
    %13 = vector.broadcast %12 : vector<1x8x8xf32> to vector<2x8x8xf32>
    %14 = arith.addf %11, %13 : vector<2x8x8xf32>
    %cst_8 = arith.constant dense<0xFF800000> : vector<2x8xf32>
    %15 = vector.multi_reduction <maximumf>, %14, %cst_8 [2] : vector<2x8x8xf32> to vector<2x8xf32>
    %16 = vector.shape_cast %15 : vector<2x8xf32> to vector<2x8x1xf32>
    %17 = vector.broadcast %16 : vector<2x8x1xf32> to vector<2x8x8xf32>
    %18 = arith.subf %14, %17 : vector<2x8x8xf32>
    %19 = math.exp %18 : vector<2x8x8xf32>
    %cst_9 = arith.constant dense<0.000000e+00> : vector<2x8xf32>
    %20 = vector.multi_reduction <add>, %19, %cst_9 [2] : vector<2x8x8xf32> to vector<2x8xf32>
    %21 = vector.shape_cast %20 : vector<2x8xf32> to vector<2x8x1xf32>
    %22 = tpu.reciprocal %21 {approx = true} : vector<2x8x1xf32> -> vector<2x8x1xf32>
    %23 = vector.broadcast %22 : vector<2x8x1xf32> to vector<2x8x8xf32>
    %24 = arith.mulf %19, %23 : vector<2x8x8xf32>
    "tpu.trace_start"() <{level = 10 : i32, message = "bqk,bkd->bqd"}> : () -> ()
    %cst_10 = arith.constant dense<0.000000e+00> : vector<2x8x8xf32>
    %25 = tpu.matmul %24, %8, %cst_10 {dimension_numbers = #tpu.dot_dimension_numbers<[2], [1], [1], [2], [0, 0, 0, 1, 1, 2], [0], [0]>} : vector<2x8x8xf32>, vector<2x8x8xf32>, vector<2x8x8xf32> -> vector<2x8x8xf32>
    "tpu.trace_stop"() : () -> ()
    %26 = vector.shape_cast %25 : vector<2x8x8xf32> to vector<16x8xf32>
    %27 = vector.extract_strided_slice %4 {offsets = [0, 0, 8], sizes = [2, 8, 8], strides = [1, 1, 1]} : vector<2x8x48xf32> to vector<2x8x8xf32>
    %28 = vector.extract_strided_slice %4 {offsets = [0, 0, 24], sizes = [2, 8, 8], strides = [1, 1, 1]} : vector<2x8x48xf32> to vector<2x8x8xf32>
    %29 = vector.extract_strided_slice %4 {offsets = [0, 0, 40], sizes = [2, 8, 8], strides = [1, 1, 1]} : vector<2x8x48xf32> to vector<2x8x8xf32>
    "tpu.trace_start"() <{level = 10 : i32, message = "bqd,bkd->bqk"}> : () -> ()
    %cst_11 = arith.constant dense<0.000000e+00> : vector<2x8x8xf32>
    %30 = tpu.matmul %27, %28, %cst_11 {dimension_numbers = #tpu.dot_dimension_numbers<[2], [2], [1], [1], [0, 0, 0, 1, 1, 1], [0], [0]>} : vector<2x8x8xf32>, vector<2x8x8xf32>, vector<2x8x8xf32> -> vector<2x8x8xf32>
    "tpu.trace_stop"() : () -> ()
    %cst_12 = arith.constant 0.353553385 : f32
    %31 = vector.broadcast %cst_12 : f32 to vector<2x8x8xf32>
    %32 = arith.mulf %30, %31 : vector<2x8x8xf32>
    %33 = vector.shape_cast %5 : vector<8x8xf32> to vector<1x8x8xf32>
    %34 = vector.broadcast %33 : vector<1x8x8xf32> to vector<2x8x8xf32>
    %35 = arith.addf %32, %34 : vector<2x8x8xf32>
    %cst_13 = arith.constant dense<0xFF800000> : vector<2x8xf32>
    %36 = vector.multi_reduction <maximumf>, %35, %cst_13 [2] : vector<2x8x8xf32> to vector<2x8xf32>
    %37 = vector.shape_cast %36 : vector<2x8xf32> to vector<2x8x1xf32>
    %38 = vector.broadcast %37 : vector<2x8x1xf32> to vector<2x8x8xf32>
    %39 = arith.subf %35, %38 : vector<2x8x8xf32>
    %40 = math.exp %39 : vector<2x8x8xf32>
    %cst_14 = arith.constant dense<0.000000e+00> : vector<2x8xf32>
    %41 = vector.multi_reduction <add>, %40, %cst_14 [2] : vector<2x8x8xf32> to vector<2x8xf32>
    %42 = vector.shape_cast %41 : vector<2x8xf32> to vector<2x8x1xf32>
    %43 = tpu.reciprocal %42 {approx = true} : vector<2x8x1xf32> -> vector<2x8x1xf32>
    %44 = vector.broadcast %43 : vector<2x8x1xf32> to vector<2x8x8xf32>
    %45 = arith.mulf %40, %44 : vector<2x8x8xf32>
    "tpu.trace_start"() <{level = 10 : i32, message = "bqk,bkd->bqd"}> : () -> ()
    %cst_15 = arith.constant dense<0.000000e+00> : vector<2x8x8xf32>
    %46 = tpu.matmul %45, %29, %cst_15 {dimension_numbers = #tpu.dot_dimension_numbers<[2], [1], [1], [2], [0, 0, 0, 1, 1, 2], [0], [0]>} : vector<2x8x8xf32>, vector<2x8x8xf32>, vector<2x8x8xf32> -> vector<2x8x8xf32>
    "tpu.trace_stop"() : () -> ()
    %47 = vector.shape_cast %46 : vector<2x8x8xf32> to vector<16x8xf32>
    %48 = tpu.concatenate %26, %47 in 1 : vector<16x8xf32>, vector<16x8xf32> -> vector<16x16xf32>
    %cst_16 = arith.constant dense<0.000000e+00> : vector<16xf32>
    %49 = vector.multi_reduction <add>, %48, %cst_16 [1] : vector<16x16xf32> to vector<16xf32>
    %50 = vector.shape_cast %49 : vector<16xf32> to vector<16x1xf32>
    %cst_17 = arith.constant 1.600000e+01 : f32
    %51 = vector.broadcast %cst_17 : f32 to vector<16x1xf32>
    %52 = arith.divf %50, %51 : vector<16x1xf32>
    %53 = vector.broadcast %52 : vector<16x1xf32> to vector<16x16xf32>
    %54 = arith.subf %48, %53 : vector<16x16xf32>
    %55 = arith.mulf %54, %54 : vector<16x16xf32>
    %cst_18 = arith.constant dense<0.000000e+00> : vector<16xf32>
    %56 = vector.multi_reduction <add>, %55, %cst_18 [1] : vector<16x16xf32> to vector<16xf32>
    %57 = vector.shape_cast %56 : vector<16xf32> to vector<16x1xf32>
    %cst_19 = arith.constant 1.600000e+01 : f32
    %58 = vector.broadcast %cst_19 : f32 to vector<16x1xf32>
    %59 = arith.divf %57, %58 : vector<16x1xf32>
    %60 = vector.broadcast %52 : vector<16x1xf32> to vector<16x16xf32>
    %61 = arith.subf %48, %60 : vector<16x16xf32>
    %cst_20 = arith.constant 9.99999974E-6 : f32
    %62 = vector.broadcast %cst_20 : f32 to vector<16x1xf32>
    %63 = arith.addf %59, %62 : vector<16x1xf32>
    %64 = math.rsqrt %63 : vector<16x1xf32>
    %65 = vector.broadcast %64 : vector<16x1xf32> to vector<16x16xf32>
    %66 = arith.mulf %61, %65 : vector<16x16xf32>
    %c0_21 = arith.constant 0 : index
    %c0_22 = arith.constant 0 : index
    %67 = vector.load %arg4[%c0_21, %c0_22] : memref<1x16xf32, #tpu.memory_space<vmem>>, vector<1x16xf32>
    %68 = vector.broadcast %67 : vector<1x16xf32> to vector<16x16xf32>
    %69 = arith.mulf %66, %68 : vector<16x16xf32>
    %c0_23 = arith.constant 0 : index
    %c0_24 = arith.constant 0 : index
    %70 = vector.load %arg5[%c0_23, %c0_24] : memref<1x16xf32, #tpu.memory_space<vmem>>, vector<1x16xf32>
    %71 = vector.broadcast %70 : vector<1x16xf32> to vector<16x16xf32>
    %72 = arith.addf %69, %71 : vector<16x16xf32>
    %c0_25 = arith.constant 0 : index
    %c0_26 = arith.constant 0 : index
    %73 = vector.load %arg6[%c0_25, %c0_26] : memref<16x64xf32, #tpu.memory_space<vmem>>, vector<16x64xf32>
    %cst_27 = arith.constant dense<0.000000e+00> : vector<16x64xf32>
    %74 = tpu.matmul %72, %73, %cst_27 {dimension_numbers = #tpu.dot_dimension_numbers<[1], [0], [0], [1], [0, 0, 1, 1], [], []>} : vector<16x16xf32>, vector<16x64xf32>, vector<16x64xf32> -> vector<16x64xf32>
    %cst_28 = arith.constant 0.000000e+00 : f32
    %75 = vector.broadcast %cst_28 : f32 to vector<16x64xf32>
    %76 = arith.maximumf %74, %75 : vector<16x64xf32>
    %c0_29 = arith.constant 0 : index
    %c0_30 = arith.constant 0 : index
    %77 = vector.load %arg7[%c0_29, %c0_30] : memref<64x32xf32, #tpu.memory_space<vmem>>, vector<64x32xf32>
    %cst_31 = arith.constant dense<0.000000e+00> : vector<16x32xf32>
    %78 = tpu.matmul %76, %77, %cst_31 {dimension_numbers = #tpu.dot_dimension_numbers<[1], [0], [0], [1], [0, 0, 1, 1], [], []>} : vector<16x64xf32>, vector<64x32xf32>, vector<16x32xf32> -> vector<16x32xf32>
    %79 = vector.shape_cast %78 : vector<16x32xf32> to vector<2x8x32xf32>
    %80 = arith.addf %79, %0 : vector<2x8x32xf32>
    %c0_32 = arith.constant 0 : index
    %c0_33 = arith.constant 0 : index
    %c0_34 = arith.constant 0 : index
    %81 = vector.load %arg8[%c0_32, %c0_33, %c0_34] : memref<2x8x32xf32, #tpu.memory_space<vmem>>, vector<2x8x32xf32>
    tpu.vector_store %arg8[%c0_32, %c0_33, %c0_34], %80 {strides = array<i32>} : memref<2x8x32xf32, #tpu.memory_space<vmem>>, vector<2x8x32xf32>,
    return
  }
  func.func @transform_0(%arg0: i32) -> (i32, i32) {
    %c0_i32 = arith.constant 0 : i32
    %c0_i32_0 = arith.constant 0 : i32
    %c0_i32_1 = arith.constant 0 : i32
    return %c0_i32, %c0_i32_0 : i32, i32
  }
  func.func @transform_1(%arg0: i32) -> (i32, i32, i32) {
    %c0_i32 = arith.constant 0 : i32
    %c0_i32_0 = arith.constant 0 : i32
    %c0_i32_1 = arith.constant 0 : i32
    return %arg0, %c0_i32, %c0_i32_0 : i32, i32, i32
  }
  func.func @transform_2(%arg0: i32) -> (i32, i32) {
    %c0_i32 = arith.constant 0 : i32
    %c0_i32_0 = arith.constant 0 : i32
    %c0_i32_1 = arith.constant 0 : i32
    return %c0_i32, %c0_i32_0 : i32, i32
  }
  func.func @transform_3(%arg0: i32) -> (i32, i32) {
    %c0_i32 = arith.constant 0 : i32
    %c0_i32_0 = arith.constant 0 : i32
    %c0_i32_1 = arith.constant 0 : i32
    return %c0_i32, %c0_i32_0 : i32, i32
  }
  func.func @transform_4(%arg0: i32) -> (i32, i32) {
    %c0_i32 = arith.constant 0 : i32
    %c0_i32_0 = arith.constant 0 : i32
    %c0_i32_1 = arith.constant 0 : i32
    return %c0_i32, %c0_i32_0 : i32, i32
  }
  func.func @transform_5(%arg0: i32) -> (i32, i32) {
    %c0_i32 = arith.constant 0 : i32
    %c0_i32_0 = arith.constant 0 : i32
    %c0_i32_1 = arith.constant 0 : i32
    return %c0_i32, %c0_i32_0 : i32, i32
  }
  func.func @transform_6(%arg0: i32) -> (i32, i32) {
    %c0_i32 = arith.constant 0 : i32
    %c0_i32_0 = arith.constant 0 : i32
    %c0_i32_1 = arith.constant 0 : i32
    return %c0_i32, %c0_i32_0 : i32, i32
  }
  func.func @transform_7(%arg0: i32) -> (i32, i32, i32) {
    %c0_i32 = arith.constant 0 : i32
    %c0_i32_0 = arith.constant 0 : i32
    %c0_i32_1 = arith.constant 0 : i32
    return %arg0, %c0_i32, %c0_i32_0 : i32, i32, i32
  }
}

</mosaic_0001>

<bundles_post_ra>
// kernel: tpu_custom_call.1
= control target key start
LH: loop header
LB: loop body
LE: loop exit
PB: predicated region body
PF: predicated region fallthrough
CT: control target
= control target key end

     0   :  { %vm33_vm0 = vcmask 261120   ;;  %s1457_s0 = inlined_call_operand.vmem [shape: f32[8,8], index: 0, kind: input, shape index: {}]   ;;  %s1458_s1 = inlined_call_operand.vmem [shape: f32[2,8,32], index: 1, kind: input, shape index: {}]   ;;  %s1459_s2 = inlined_call_operand.vmem [shape: f32[32,48], index: 2, kind: input, shape index: {}]   ;;  %s1460_s3 = inlined_call_operand.vmem [shape: f32[1,16], index: 3, kind: input, shape index: {}]   ;;  %s1461_s4 = inlined_call_operand.vmem [shape: f32[1,16], index: 4, kind: input, shape index: {}]   ;;  %s1462_s5 = inlined_call_operand.vmem [shape: f32[16,64], index: 5, kind: input, shape index: {}]   ;;  %s1463_s6 = inlined_call_operand.vmem [shape: f32[64,32], index: 6, kind: input, shape index: {}]   ;;  %s1464_s7 = inlined_call_operand.hbm [shape: f32[2,8,32], index: 7, kind: output, shape index: {}]  }
   0x1   :  { %v29_v0 = vld [vmem:[%s1459_s2] sm:$0xff]  ;;  %v30_v1 = vld [vmem:[%s1459_s2 + $0x8] sm:$0xff]  ;;  %v31_v2 = vld [vmem:[%s1459_s2 + $0x10] sm:$0xff] }
   0x2   :  { %v1167_v3 = vpack.c.bf16 %v30_v1, %v29_v0  ;;  %v32_v4 = vld [vmem:[%s1459_s2 + $0x18] sm:$0xff]  ;;  %v1314_v5 = vld [vmem:[%s1458_s1] sm:$0xff] }
   0x3   :  { %v1171_v6 = vpack.c.bf16 %v32_v4, %v31_v2  ;;  %1098 = vmatprep.mubr.msk.f32.mxu0 %vm33_vm0, %v1314_v5 }
   0x4   :  { %12 = vsyncpa [#allocation3], 0  ;;  %1168 = vmatprep.subr.bf16.mxu0 %v1167_v3  ;;  %v1321_v7 = vld [vmem:[%s1458_s1 + $0x8] sm:$0xff]  ;;  %v1249_v8 = vmov 0.0   ;;  %vm1250_vm1 = vmmov 0   ;;  %s1251_s1 = smov 112  }
   0x5   :  { %1170 = vmatpush3.bf16.msra.mxu0 %v1167_v3  ;;  %1106 = vmatprep.subr.mxu1 %v1249_v8  ;;  %vm119_vm2 = vcmask 64512   ;;  %v1352_v14 = vld [vmem:[%s1457_s0] sm:$0xff]  ;;  %s1252_s14 = smov 96   ;;  %s1253_s0 = smov 104   ;;  %vm793_vm3 = vcmask 130048   ;;  %vm932_vm4 = vcmask 523264  }
   0x6   :  { %1172 = vmatprep.subr.bf16.mxu0 %v1171_v6  ;;  %1108 = vmatprep.mubr.msk.f32.mxu1 %vm1250_vm1, %v1249_v8  ;;  %s1254_s15 = smov 120   ;;  %s1255_s16 = smov 88  }
   0x7   :  { %s1256_s17 = smov 8  }
   0x9   :  { %1174 = vmatpush3.bf16.msra.mxu0 %v1171_v6 }
   0xa   :  { %1101 = vmatprep.subr.mxu0 %v1249_v8 }
   0xc   :  { %1099 = vmatmul.mubr.msk.f32.vlgmr.msra.gmra.mrb[0].mxu0 %vm33_vm0, %v1321_v7 }
   0xd   :  { %1103 = vmatprep.mubr.msk.f32.mxu0 %vm1250_vm1, %v1249_v8 }
  0xdf   :  { %v1331_v9 = vpop.f32.mrb[0].mxu0 }
  0xe0   :  { %v1333_v10 = vpop.f32.mrb[1].mxu0 }
  0xe1   :  { %117 = vrot.lane.b32.xlu0 %v1333_v10, %s1251_s1 }
  0xe5   :  { %195 = vrot.lane.b32.xlu0 %v1331_v9, %s1251_s1 }
 0x153   :  { %v118_v11 = vpop.permute.xlu0 %117 }
 0x154   :  { %1102 = vmatpush3.xpose.msk.msra.mxu0 %vm119_vm2, %v118_v11 }
 0x155   :  { %1111 = vmatprep.subr.mxu0 %v1249_v8 }
 0x157   :  { %1104 = vmatmul.mubr.msk.f32.vlgmr.msra.gmra.mrb[2].mxu0 %vm119_vm2, %v1333_v10  ;;  %v196_v12 = vpop.permute.xlu0 %195 }
 0x158   :  { %1107 = vmatpush3.xpose.msk.msra.mxu1 %vm119_vm2, %v196_v12  ;;  %1113 = vmatprep.mubr.msk.f32.mxu0 %vm1250_vm1, %v1249_v8 }
 0x159   :  { %1116 = vmatprep.subr.mxu1 %v1249_v8 }
 0x15b   :  { %1109 = vmatmul.mubr.msk.f32.vlgmr.msra.gmra.mrb[0].mxu1 %vm119_vm2, %v1331_v9 }
 0x15c   :  { %1118 = vmatprep.mubr.msk.f32.mxu1 %vm1250_vm1, %v1249_v8 }
 0x22a   :  { %v190_v13 = vpop.f32.mrb[2].mxu0 }
 0x22b   :  { %v271_v15 = vmul.f32 0.35355338, %v190_v13  ;;  %v1105_v16 = vpop.f32.mrb[3].mxu0 }
 0x22d   :  { %v273_v17 = vadd.f32 %v271_v15, %v1352_v14 }
 0x22e   :  { %v267_v18 = vpop.f32.mrb[0].mxu1 }
 0x22f   :  { %v272_v19 = vmul.f32 0.35355338, %v267_v18  ;;  %v1110_v20 = vpop.f32.mrb[1].mxu1  ;;  %v275_v21 = vsel %vm119_vm2, %v273_v17, -inf }
 0x230   :  { %276 = vmax.xlane.f32.xlu1 %v275_v21 }
 0x231   :  { %v274_v22 = vadd.f32 %v272_v19, %v1352_v14 }
 0x233   :  { %v278_v23 = vsel %vm119_vm2, %v274_v22, -inf }
 0x234   :  { %279 = vmax.xlane.f32.xlu1 %v278_v23 }
 0x245   :  { %297 = vrot.lane.b32.xlu1 %v1333_v10, %s1252_s14 }
 0x249   :  { %373 = vrot.lane.b32.xlu1 %v1331_v9, %s1252_s14 }
 0x24d   :  { %451 = vrot.lane.b32.xlu1 %v1333_v10, %s1253_s0 }
 0x251   :  { %529 = vrot.lane.b32.xlu1 %v1331_v9, %s1253_s0 }
 0x2bd   :  { %v277_v24 = vpop.xlane.xlu1 %276 }
 0x2be   :  { %v281_v25 = vsub.f32 %v273_v17, %v277_v24 }
 0x2c0   :  { %v283_v26 = vmul.f32 1.442695, %v281_v25 }
 0x2c1   :  { %v280_v27 = vpop.xlane.xlu1 %279 }
 0x2c2   :  { %1205 = vpow2.f32 %v283_v26  ;;  %v282_v28 = vsub.f32 %v274_v22, %v280_v27 }
 0x2c4   :  { %v285_v29 = vmul.f32 1.442695, %v282_v28 }
 0x2c5   :  { %v298_v30 = vpop.permute.xlu1 %297 }
 0x2c6   :  { %1207 = vpow2.f32 %v285_v29  ;;  %1112 = vmatpush3.msra.mxu0 %v298_v30 }
 0x2c7   :  { %1121 = vmatprep.subr.mxu0 %v1249_v8 }
 0x2c9   :  { %v374_v31 = vpop.permute.xlu1 %373 }
 0x2ca   :  { %1117 = vmatpush3.msra.mxu1 %v374_v31 }
 0x2cb   :  { %1126 = vmatprep.subr.mxu1 %v1249_v8 }
 0x2cc   :  { %v1206_v32 = vpop.eup %1205 }
 0x2cd   :  { %v287_v33 = vsel %vm119_vm2, %v1206_v32, 0.0  ;;  %v452_v36 = vpop.permute.xlu1 %451 }
 0x2ce   :  { %288 = vadd.xlane.f32.xlu0 %v287_v33 }
 0x2d0   :  { %v1208_v34 = vpop.eup %1207 }
 0x2d1   :  { %v290_v35 = vsel %vm119_vm2, %v1208_v34, 0.0  ;;  %v530_v37 = vpop.permute.xlu1 %529 }
 0x2d2   :  { %291 = vadd.xlane.f32.xlu1 %v290_v35 }
 0x2e3   :  { %527 = vrot.lane.b32.xlu1 %v1331_v9, %s1254_s15 }
 0x2e4   :  { %449 = vrot.lane.b32.xlu0 %v1333_v10, %s1254_s15 }
 0x35b   :  { %v289_v38 = vpop.xlane.xlu0 %288 }
 0x35c   :  { %1209 = vrcp.f32 %v289_v38 }
 0x35f   :  { %v292_v39 = vpop.xlane.xlu1 %291  ;;  %v450_v44 = vpop.permute.xlu0 %449 }
 0x360   :  { %1211 = vrcp.f32 %v292_v39  ;;  %v924_v39 = vld [vmem:[%s1463_s6] sm:$0xff] }
 0x363   :  { %v528_v45 = vpop.permute.xlu1 %527 }
 0x366   :  { %v1210_v40 = vpop.eup %1209 }
 0x367   :  { %v295_v41 = vmul.f32 %v1210_v40, %v1206_v32  ;;  %v925_v40 = vld [vmem:[%s1463_s6 + $0x8] sm:$0xff] }
 0x369   :  { %1114 = vmatmul.mubr.msk.f32.vlgmr.msra.gmra.mrb[4].mxu0 %vm119_vm2, %v295_v41  ;;  %v926_v41 = vld [vmem:[%s1463_s6 + $0x10] sm:$0xff] }
 0x36a   :  { %v1212_v42 = vpop.eup %1211  ;;  %1122 = vmatpush3.xpose.msk.msra.mxu0 %vm119_vm2, %v452_v36  ;;  %1123 = vmatprep.mubr.msk.f32.mxu0 %vm1250_vm1, %v1249_v8  ;;  %v839_v36 = vld [vmem:[%s1462_s5] sm:$0xff] }
 0x36b   :  { %v296_v43 = vmul.f32 %v1212_v42, %v1208_v34  ;;  %1131 = vmatprep.subr.mxu0 %v1249_v8  ;;  %v1179_v42 = vpack.c.bf16 %v925_v40, %v924_v39 }
 0x36d   :  { %1119 = vmatmul.mubr.msk.f32.vlgmr.msra.gmra.mrb[2].mxu1 %vm119_vm2, %v296_v43  ;;  %1124 = vmatmul.mubr.msk.f32.vlgmr.msra.gmra.mrb[6].mxu0 %vm119_vm2, %v450_v44  ;;  %v927_v43 = vld [vmem:[%s1463_s6 + $0x18] sm:$0xff] }
 0x36e   :  { %1127 = vmatpush3.xpose.msk.msra.mxu1 %vm119_vm2, %v530_v37  ;;  %1128 = vmatprep.mubr.msk.f32.mxu1 %vm1250_vm1, %v1249_v8  ;;  %v840_v37 = vld [vmem:[%s1462_s5 + $0x8] sm:$0xff]  ;;  %v1183_v44 = vpack.c.bf16 %v927_v43, %v926_v41 }
 0x36f   :  { %1136 = vmatprep.subr.mxu1 %v1249_v8  ;;  %1133 = vmatprep.mubr.msk.f32.mxu0 %vm1250_vm1, %v1249_v8  ;;  %v1175_v38 = vpack.c.bf16 %v840_v37, %v839_v36 }
 0x371   :  { %1129 = vmatmul.mubr.msk.f32.vlgmr.msra.gmra.mrb[4].mxu1 %vm119_vm2, %v528_v45  ;;  %v928_v45 = vld [vmem:[%s1463_s6 + $0x20] sm:$0xff] }
 0x372   :  { %1138 = vmatprep.mubr.msk.f32.mxu1 %vm1250_vm1, %v1249_v8 }
 0x43c   :  { %v369_v46 = vpop.f32.mrb[4].mxu0 }
 0x43d   :  { %v1115_v47 = vpop.f32.mrb[5].mxu0 }
 0x440   :  { %v445_v48 = vpop.f32.mrb[2].mxu1  ;;  %v523_v49 = vpop.f32.mrb[6].mxu0 }
 0x441   :  { %v605_v50 = vmul.f32 0.35355338, %v523_v49  ;;  %v1120_v51 = vpop.f32.mrb[3].mxu1  ;;  %v1125_v52 = vpop.f32.mrb[7].mxu0 }
 0x443   :  { %v607_v53 = vadd.f32 %v605_v50, %v1352_v14 }
 0x444   :  { %v601_v54 = vpop.f32.mrb[4].mxu1 }
 0x445   :  { %v606_v55 = vmul.f32 0.35355338, %v601_v54  ;;  %v1130_v56 = vpop.f32.mrb[5].mxu1  ;;  %v609_v57 = vsel %vm119_vm2, %v607_v53, -inf }
 0x446   :  { %610 = vmax.xlane.f32.xlu1 %v609_v57  ;;  %v1049_v57 = vld [vmem:[%s1461_s4] ss:$0 sm:$0xff]  ;;  %s1257_s4 = smov [#allocation2]  }
 0x447   :  { %v608_v58 = vadd.f32 %v606_v55, %v1352_v14  ;;  %v1048_v55 = vld [vmem:[%s1460_s3] ss:$0 sm:$0xff]  ;;  %s1023_s0 = sshll.u32 %s1257_s4, 4  ;;  %s1024_s0 = int_to_ptr.vmem [resolvable:$true] %s1023_s0 }
 0x448   :  { %p1230_p1 = scmp.lt.s32.totalorder %s1024_s0, %s1024_s0 }
 0x449   :  { %v612_v59 = vsel %vm119_vm2, %v608_v58, -inf }
 0x44a   :  { %613 = vmax.xlane.f32.xlu0 %v612_v59 }
 0x460   :  { %707 = vrot.lane.b32.xlu0 %v1331_v9, %s1255_s16 }
 0x4d3   :  { %v611_v60 = vpop.xlane.xlu1 %610 }
 0x4d4   :  { %v615_v61 = vsub.f32 %v607_v53, %v611_v60 }
 0x4d6   :  { %v617_v0 = vmul.f32 1.442695, %v615_v61 }
 0x4d7   :  { %v614_v62 = vpop.xlane.xlu0 %613 }
 0x4d8   :  { %v616_v63 = vsub.f32 %v608_v58, %v614_v62 }
 0x4da   :  { %v619_v1 = vmul.f32 1.442695, %v616_v63 }
 0x4db   :  { %v708_v2 = vpop.permute.xlu0 %707 }
 0x4dc   :  { %1213 = vpow2.f32 %v619_v1  ;;  %1137 = vmatpush3.msra.mxu1 %v708_v2  ;;  %v931_v1 = vld [vmem:[%s1463_s6 + $0x38] sm:$0xff] }
 0x4dd   :  { %1215 = vpow2.f32 %v617_v0  ;;  %1180 = vmatprep.subr.bf16.mxu1 %v1179_v42  ;;  %v930_v0 = vld [vmem:[%s1463_s6 + $0x30] sm:$0xff] }
 0x4de   :  { %v1191_v2 = vpack.c.bf16 %v931_v1, %v930_v0 }
 0x4e6   :  { %v1214_v3 = vpop.eup %1213 }
 0x4e7   :  { %v624_v4 = vsel %vm119_vm2, %v1214_v3, 0.0  ;;  %v1216_v6 = vpop.eup %1215 }
 0x4e8   :  { %625 = vadd.xlane.f32.xlu1 %v624_v4  ;;  %v621_v8 = vsel %vm119_vm2, %v1216_v6, 0.0 }
 0x4ec   :  { %622 = vadd.xlane.f32.xlu1 %v621_v8 }
 0x4fd   :  { %631 = vrot.lane.b32.xlu1 %v1333_v10, %s1255_s16 }
 0x575   :  { %v626_v9 = vpop.xlane.xlu1 %625 }
 0x576   :  { %1217 = vrcp.f32 %v626_v9 }
 0x579   :  { %v623_v11 = vpop.xlane.xlu1 %622 }
 0x57a   :  { %1219 = vrcp.f32 %v623_v11 }
 0x57d   :  { %v632_v12 = vpop.permute.xlu1 %631 }
 0x57e   :  { %1132 = vmatpush3.msra.mxu0 %v632_v12 }
 0x57f   :  { %1176 = vmatprep.subr.bf16.mxu0 %v1175_v38 }
 0x580   :  { %v1218_v13 = vpop.eup %1217 }
 0x581   :  { %v630_v14 = vmul.f32 %v1218_v13, %v1214_v3 }
 0x583   :  { %1139 = vmatmul.mubr.msk.f32.vlgmr.msra.gmra.mrb[6].mxu1 %vm119_vm2, %v630_v14 }
 0x584   :  { %v1220_v15 = vpop.eup %1219  ;;  %1182 = vmatpush3.bf16.msra.mxu1 %v1179_v42 }
 0x585   :  { %v629_v16 = vmul.f32 %v1220_v15, %v1216_v6  ;;  %1184 = vmatprep.subr.bf16.mxu1 %v1183_v44 }
 0x587   :  { %1134 = vmatmul.mubr.msk.f32.vlgmr.msra.gmra.mrb[8].mxu0 %vm119_vm2, %v629_v16 }
 0x588   :  { %1178 = vmatpush3.bf16.msra.mxu0 %v1175_v38  ;;  %1186 = vmatpush3.bf16.msra.mxu1 %v1183_v44 }
 0x656   :  { %v779_v17 = vpop.f32.mrb[6].mxu1 }
 0x657   :  { %v1140_v18 = vpop.f32.mrb[7].mxu1 }
 0x65a   :  { %v703_v19 = vpop.f32.mrb[8].mxu0 }
 0x65b   :  { %785 = vrot.lane.b32.xlu1 %v703_v19, %s1256_s17  ;;  %v1135_v10 = vpop.f32.mrb[9].mxu0 }
 0x65f   :  { %787 = vrot.lane.b32.xlu1 %v779_v17, %s1256_s17 }
 0x6cd   :  { %v786_v20 = vpop.permute.xlu1 %785 }
 0x6ce   :  { %v791_v21 = vsel %vm119_vm2, %v369_v46, %v786_v20  ;;  %v929_v46 = vld [vmem:[%s1463_s6 + $0x28] sm:$0xff]  ;;  %s1225_s6 = scalar_lea.vmem %s1024_s0, 256 }
 0x6cf   :  { %v794_v22 = vsel %vm793_vm3, %v791_v21, 0.0  ;;  %v1187_v47 = vpack.c.bf16 %v929_v46, %v928_v45  ;;  %p1226_p0 = scmp.ne.s32.totalorder %s1024_s0, %s1225_s6  ;;  %p1231_p2 = scmp.lt.s32.totalorder %s1225_s6, %s1225_s6 }
 0x6d0   :  { %795 = vadd.xlane.f32.xlu0 %v794_v22 }
 0x6d1   :  { %v788_v23 = vpop.permute.xlu1 %787  ;;  %1188 = vmatprep.subr.bf16.mxu1 %v1187_v47  ;;  %p1232_p3 = por %p1231_p2, %p1230_p1 }
 0x6d2   :  { %v792_v24 = vsel %vm119_vm2, %v445_v48, %v788_v23  ;;  %1190 = vmatpush3.bf16.msra.mxu1 %v1187_v47 }
 0x6d3   :  { %v797_v25 = vsel %vm793_vm3, %v792_v24, 0.0  ;;  %1192 = vmatprep.subr.bf16.mxu1 %v1191_v2  ;;  %p1233_p4 = pnand %p1232_p3, %p1226_p0 }
 0x6d4   :  { %798 = vadd.xlane.f32.xlu1 %v797_v25 }
 0x6d6   :  { %1194 = vmatpush3.bf16.msra.mxu1 %v1191_v2 }
 0x75d   :  { %v796_v26 = vpop.xlane.xlu0 %795 }
 0x75e   :  { %v801_v27 = vmul.f32 0.0625, %v796_v26 }
 0x760   :  { %v803_v28 = vsub.f32 %v791_v21, %v801_v27 }
 0x761   :  { %v799_v29 = vpop.xlane.xlu1 %798 }
 0x762   :  { %v802_v30 = vmul.f32 0.0625, %v799_v29  ;;  %v805_v31 = vmul.f32 %v803_v28, %v803_v28 }
 0x764   :  { %v804_v32 = vsub.f32 %v792_v24, %v802_v30  ;;  %v807_v33 = vsel %vm793_vm3, %v805_v31, 0.0 }
 0x765   :  { %808 = vadd.xlane.f32.xlu0 %v807_v33 }
 0x766   :  { %v806_v34 = vmul.f32 %v804_v32, %v804_v32 }
 0x768   :  { %v810_v35 = vsel %vm793_vm3, %v806_v34, 0.0 }
 0x769   :  { %811 = vadd.xlane.f32.xlu0 %v810_v35 }
 0x7f2   :  { %v809_v48 = vpop.xlane.xlu0 %808 }
 0x7f3   :  { %v813_v49 = vmul.f32 0.0625, %v809_v48 }
 0x7f5   :  { %v815_v50 = vadd.f32 1e-05, %v813_v49 }
 0x7f6   :  { %v812_v51 = vpop.xlane.xlu0 %811 }
 0x7f7   :  { %1221 = vrsqrt.f32 %v815_v50  ;;  %v814_v52 = vmul.f32 0.0625, %v812_v51 }
 0x7f9   :  { %v816_v53 = vadd.f32 1e-05, %v814_v52 }
 0x7fb   :  { %1223 = vrsqrt.f32 %v816_v53 }
 0x801   :  { %v1222_v54 = vpop.eup %1221 }
 0x802   :  { %v819_v56 = vmul.f32 %v1222_v54, %v803_v28 }
 0x804   :  { %v828_v58 = vmul.f32 %v1048_v55, %v819_v56 }
 0x805   :  { %v1224_v59 = vpop.eup %1223 }
 0x806   :  { %v820_v60 = vmul.f32 %v1224_v59, %v804_v32  ;;  %v837_v61 = vadd.f32 %v1049_v57, %v828_v58 }
 0x808   :  { %v829_v62 = vmul.f32 %v1048_v55, %v820_v60  ;;  %1145 = vmatprep.mubr.msk.f32.mxu0 %vm793_vm3, %v837_v61 }
 0x80a   :  { %v838_v63 = vadd.f32 %v1049_v57, %v829_v62 }
 0x80c   :  { %1146 = vmatmul.mubr.msk.f32.vlgmr.msra.gmra.mrb[10].mxu0 %vm793_vm3, %v838_v63 }
 0x8df   :  { %v1147_v3 = vpop.f32.mrb[10].mxu0 }
 0x8e0   :  { %v913_v4 = vpop.f32.mrb[11].mxu0  ;;  %v923_v8 = vmax.f32 %v1147_v3, 0.0 }
 0x8e1   :  { %v922_v6 = vmax.f32 %v913_v4, 0.0 }
 0x8e3   :  { %1164 = vmatprep.mubr.msk.f32.mxu1 %vm932_vm4, %v922_v6 }
 0x8e4   :  { %1165 = vmatmul.mubr.msk.f32.vlgmr.msra.gmra.mrb[8].mxu1 %vm932_vm4, %v923_v8 }
 0x9b7   :  { %v1166_v9 = vpop.f32.mrb[8].mxu1 }
 0x9b8   :  { %v1015_v11 = vadd.f32 %v1166_v9, %v1321_v7  ;;  %v1005_v12 = vpop.f32.mrb[9].mxu1 }
 0x9b9   :  { %v1014_v13 = vadd.f32 %v1005_v12, %v1314_v5 }
 0x9ba   :  { %1017 = vst.msk [vmem:[#allocation2 + $0x8] sm:$0xff] %vm33_vm0, %v1015_v11 }
 0x9bb   :  { %1016 = vst.msk [vmem:[#allocation2] sm:$0xff] %vm33_vm0, %v1014_v13 }
 0x9bc   :  { %1236 = shalt.err (!%p1233_p4)
}
 0x9bd   :  { %s1237_s18 = scalar_lea.hbm %s1464_s7, 256 }
 0x9be   :  { %p1238_p5 = scmp.ne.s32.totalorder %s1464_s7, %s1237_s18  ;;  %p1241_p6 = scmp.lt.u32.totalorder %s1237_s18, %s1464_s7 }
 0x9c0   :  { %p1243_p7 = pnand %p1241_p6, %p1238_p5 }
 0x9c2   :  { %1246 = shalt.err (!%p1243_p7)
}
 0x9c3   :  { %s1258_s23 = smov 128  }
 0x9c4   :  { %1029 = dma.vmem_to_hbm [thread:$0]  %s1024_s0, 256, %s1464_s7, [#allocation3], %s1258_s23, %s1258_s23, %s1256_s17  }
 0x9c5   :  { %1247 = dma.done.wait [#allocation3], 256  }
 0x9c6   :  { %1248 = vsyncadd [#allocation3], 4294967040 }
 0x9c7   :  { %1033 = vsyncpa [#allocation3], 1 }

</bundles_post_ra>
